<compile_context>
chip_gen: v7x
topology: tpu7x:2x2x1
jax: 0.10.0
libtpu: 0.0.40
codegen_flags: <defaults>
</compile_context>

<pallas_src>
import functools

import jax
import jax.numpy as jnp
from jax.experimental import pallas as pl
from jax.experimental.pallas import tpu as pltpu


# ------------------------------ fused kernel ------------------------------- #
def _fused_kernel(x_ref, w1_ref, b1_ref, w2_ref, b2_ref, wo_ref, bo_ref,
                  o_ref, h_ref, *, alpha, L1, L2):
    # x_ref : (T+2, C_in)   one batch element, conv pad=1 rows pre-applied in HBM
    # w1_ref: (4*C_in, Hp)  b1_ref: (1, Hp)     (tap-major stacked conv weights)
    # w2_ref: (4*Hp,  Np)   b2_ref: (1, Np)
    # wo_ref: (Np, Np)      bo_ref: (1, Np)
    # o_ref : (L2, Np)      output block (lane-dense, unmasked store)
    # h_ref : (L1+2, Hp)    VMEM scratch; rows 0 and L1+1 are conv2's zero pads
    cdt = h_ref.dtype

    def lrelu(v):                       # LeakyReLU(0.2): one vmul + one vmax
        return jnp.maximum(v, alpha * v)

    def conv4_s2(src_ref, L, w_ref, b_ref):
        # Conv1d(k=4, s=2, p=1) as a single contraction over (tap, channel).
        # src_ref has one zero pad row at top and bottom, so output position j
        # reads padded rows 2j+k, k=0..3  ->  4 plain strided loads.
        taps = [src_ref[pl.ds(k, L, stride=2), :] for k in range(4)]
        stacked = jnp.concatenate(taps, axis=1)                 # (L, 4*C)
        acc = jnp.dot(stacked, w_ref[...],
                      preferred_element_type=jnp.float32)       # K = 4*C on MXU
        return acc + b_ref[...]                                 # f32 bias add

    # Zero conv2's pad rows every step (scratch is uninitialized and persists
    # across grid steps; unconditional zeroing is also megacore-safe).
    zrow = jnp.zeros((1, h_ref.shape[1]), cdt)
    h_ref[0:1, :] = zrow
    h_ref[L1 + 1:L1 + 2, :] = zrow

    # Conv1 + LeakyReLU -> VMEM scratch (Dropout = identity in eval mode).
    h_ref[1:1 + L1, :] = lrelu(conv4_s2(x_ref, L1, w1_ref, b1_ref)).astype(cdt)

    # Conv2 + LeakyReLU (kept as a value), then out_net Linear.
    z = lrelu(conv4_s2(h_ref, L2, w2_ref, b2_ref))
    o_ref[...] = (jnp.dot(z.astype(wo_ref.dtype), wo_ref[...],
                          preferred_element_type=jnp.float32)
                  + bo_ref[...]).astype(o_ref.dtype)


# -------------------------------- wrapper ----------------------------------- #
def _round_up(n, m):
    return (n + m - 1) // m * m


def _vmem_limit_bytes():
    # Generation-aware VMEM budget: ~80% of physical, capped at 100 MB
    # (v5e/v6e: 128 MiB -> 100 MB; v7x: 64 MiB -> ~51 MB). Safe fallback 51 MB.
    cap = 64 * 1024 * 1024
    try:
        cap = int(pltpu.get_tpu_info().vmem_capacity_bytes)
    except Exception:
        pass
    return min(int(cap * 0.8), 100 * 1024 * 1024)


def movement_conv_encoder(x, params, *, alpha=0.2, compute_dtype=jnp.float32):
    """x: (B, T, input_size) -> (B, T//4, output_size).

    compute_dtype: matmul operand / hidden-scratch dtype. Use jnp.bfloat16 at
    production scale (accumulation stays f32), jnp.float32 for exactness.
    """
    B, T, C_in = x.shape
    assert T % 4 == 0 and T >= 4, "kernel assumes T divisible by 4"
    H = params["w1"].shape[2]
    N = params["w2"].shape[2]
    Hp = _round_up(H, 128)          # lane-dense hidden width
    Np = _round_up(N, 128)          # lane-dense output width
    L1, L2 = T // 2, T // 4
    out_dtype = x.dtype

    # Conv pad=1 applied once in HBM: one zero time-row at each end.
    xp = jnp.pad(x, ((0, 0), (1, 1), (0, 0))).astype(compute_dtype)

    # Weights tap-major (4, C, C_out) -> stacked (4*C, C_out); feature axes
    # zero-padded to 128 multiples (padded columns stay exactly zero end-to-end).
    w1p = jnp.pad(params["w1"], ((0, 0), (0, 0), (0, Hp - H))
                  ).reshape(4 * C_in, Hp).astype(compute_dtype)
    b1p = jnp.pad(params["b1"], (0, Hp - H)).reshape(1, Hp).astype(jnp.float32)
    w2p = jnp.pad(params["w2"], ((0, 0), (0, Hp - H), (0, Np - N))
                  ).reshape(4 * Hp, Np).astype(compute_dtype)
    b2p = jnp.pad(params["b2"], (0, Np - N)).reshape(1, Np).astype(jnp.float32)
    wop = jnp.pad(params["wo"], ((0, Np - N), (0, Np - N))).astype(compute_dtype)
    bop = jnp.pad(params["bo"], (0, Np - N)).reshape(1, Np).astype(jnp.float32)

    # Advisory cost so XLA schedules surrounding ops around the custom call.
    item = jnp.dtype(compute_dtype).itemsize
    flops = 2 * B * (L1 * (4 * C_in) * Hp + L2 * (4 * Hp) * Np + L2 * Np * Np)
    bytes_accessed = (B * (T + 2) * C_in * item
                      + (w1p.size + w2p.size + wop.size) * item
                      + (b1p.size + b2p.size + bop.size) * 4
                      + B * L2 * Np * jnp.dtype(out_dtype).itemsize)
    cost = pl.CostEstimate(flops=int(flops), transcendentals=0,
                           bytes_accessed=int(bytes_accessed))

    kernel = functools.partial(_fused_kernel, alpha=alpha, L1=L1, L2=L2)
    out = pl.pallas_call(
        kernel,
        out_shape=jax.ShapeDtypeStruct((B, L2, Np), out_dtype),
        grid=(B,),
        in_specs=[
            pl.BlockSpec((None, T + 2, C_in), lambda b: (b, 0, 0)),  # x (per-batch)
            pl.BlockSpec((4 * C_in, Hp), lambda b: (0, 0)),          # w1 (resident)
            pl.BlockSpec((1, Hp), lambda b: (0, 0)),                 # b1
            pl.BlockSpec((4 * Hp, Np), lambda b: (0, 0)),            # w2
            pl.BlockSpec((1, Np), lambda b: (0, 0)),                 # b2
            pl.BlockSpec((Np, Np), lambda b: (0, 0)),                # wo
            pl.BlockSpec((1, Np), lambda b: (0, 0)),                 # bo
        ],
        out_specs=pl.BlockSpec((None, L2, Np), lambda b: (b, 0, 0)),
        scratch_shapes=[pltpu.VMEM((L1 + 2, Hp), compute_dtype)],    # hidden act
        compiler_params=pltpu.CompilerParams(
            dimension_semantics=("parallel",),
            vmem_limit_bytes=_vmem_limit_bytes(),
        ),
        cost_estimate=cost,
    )(xp, w1p, b1p, w2p, b2p, wop, bop)

    # Skip the HBM->HBM slice copy when N is already lane-dense (prod N=512).
    return out if Np == N else out[..., :N]


# --------------------------- parameter construction ------------------------- #
def _xavier_normal(key, shape, fan_in, fan_out):
    std = (2.0 / (fan_in + fan_out)) ** 0.5
    return std * jax.random.normal(key, shape, dtype=jnp.float32)


def init_params(key, input_size, hidden_size, output_size, kernel=4):
    # Conv weights stored tap-major (kernel, C_in, C_out); Linear as (in, out).
    # Fan-in/out match PyTorch xavier_normal_ on Conv1d/Linear. Biases zero.
    k1, k2, k3 = jax.random.split(key, 3)
    w1 = _xavier_normal(k1, (kernel, input_size, hidden_size),
                        fan_in=input_size * kernel, fan_out=hidden_size * kernel)
    w2 = _xavier_normal(k2, (kernel, hidden_size, output_size),
                        fan_in=hidden_size * kernel, fan_out=output_size * kernel)
    wo = _xavier_normal(k3, (output_size, output_size),
                        fan_in=output_size, fan_out=output_size)
    return {
        "w1": w1, "b1": jnp.zeros((hidden_size,), jnp.float32),
        "w2": w2, "b2": jnp.zeros((output_size,), jnp.float32),
        "wo": wo, "bo": jnp.zeros((output_size,), jnp.float32),
    }


# ----------------------------- plain-JAX reference -------------------------- #
def _reference(x, params, alpha=0.2):
    def lrelu(v):
        return jnp.where(v >= 0, v, alpha * v)

    def conv(v, w, b):  # Conv1d(k=4, s=2, p=1), channels-last
        _, Tv, _ = v.shape
        L = Tv // 2
        vp = jnp.pad(v, ((0, 0), (1, 1), (0, 0)))
        y = b
        for t in range(4):
            y = y + jnp.einsum("blc,cn->bln", vp[:, t:t + 2 * L:2, :], w[t])
        return y

    h = lrelu(conv(x, params["w1"], params["b1"]))
    z = lrelu(conv(h, params["w2"], params["b2"]))
    return jnp.einsum("bln,nm->blm", z, params["wo"]) + params["bo"]


# ----------------------------------- main ------------------------------------ #
if __name__ == "__main__":
    B, T = 2, 16
    input_size, hidden_size, output_size = 8, 16, 16

    key = jax.random.PRNGKey(0)
    kx, kp = jax.random.split(key)
    x = jax.random.normal(kx, (B, T, input_size), dtype=jnp.float32)
    params = init_params(kp, input_size, hidden_size, output_size)

    # Exact (f32) path: must match the pure-JAX reference.
    out = jax.jit(movement_conv_encoder)(x, params)
    out = jax.block_until_ready(out)
    assert out.shape == (B, T // 4, output_size), out.shape
    ref = _reference(x, params)
    err = float(jnp.max(jnp.abs(out - ref)))
    assert jnp.allclose(out, ref, atol=2e-5, rtol=2e-5), err

    # Production (bf16 operands, f32 accumulation) path: runs clean.
    out_bf16 = jax.jit(functools.partial(
        movement_conv_encoder, compute_dtype=jnp.bfloat16))(x, params)
    out_bf16 = jax.block_until_ready(out_bf16)
    assert out_bf16.shape == (B, T // 4, output_size), out_bf16.shape
    assert bool(jnp.isfinite(out_bf16).all())

    print("KERNEL_OK")
</pallas_src>

<mosaic_0001>
module attributes {stable_mosaic.version = 11 : i64} {
  func.func @_fused_kernel(%arg0: i32, %arg1: memref<1x18x8xf32, #tpu.memory_space<vmem>>, %arg2: memref<32x128xf32, #tpu.memory_space<vmem>>, %arg3: memref<1x128xf32, #tpu.memory_space<vmem>>, %arg4: memref<512x128xf32, #tpu.memory_space<vmem>>, %arg5: memref<1x128xf32, #tpu.memory_space<vmem>>, %arg6: memref<128x128xf32, #tpu.memory_space<vmem>>, %arg7: memref<1x128xf32, #tpu.memory_space<vmem>>, %arg8: memref<1x4x128xf32, #tpu.memory_space<vmem>>, %arg9: memref<10x128xf32, #tpu.memory_space<vmem>>) attributes {dimension_semantics = [#tpu.dimension_semantics<parallel>], iteration_bounds = array<i64: 2>, scalar_prefetch = 0 : i64, scratch_operands = 1 : i64, tpu.core_type = #tpu.core_type<tc>, window_params = [{transform_indices = @transform_0, window_bounds = array<i64: 1, 18, 8>}, {pipeline_mode = #tpu.pipeline_mode<synchronous>, transform_indices = @transform_1, window_bounds = array<i64: 32, 128>}, {pipeline_mode = #tpu.pipeline_mode<synchronous>, transform_indices = @transform_2, window_bounds = array<i64: 1, 128>}, {pipeline_mode = #tpu.pipeline_mode<synchronous>, transform_indices = @transform_3, window_bounds = array<i64: 512, 128>}, {pipeline_mode = #tpu.pipeline_mode<synchronous>, transform_indices = @transform_4, window_bounds = array<i64: 1, 128>}, {pipeline_mode = #tpu.pipeline_mode<synchronous>, transform_indices = @transform_5, window_bounds = array<i64: 128, 128>}, {pipeline_mode = #tpu.pipeline_mode<synchronous>, transform_indices = @transform_6, window_bounds = array<i64: 1, 128>}, {transform_indices = @transform_7, window_bounds = array<i64: 1, 4, 128>}]} {
    %cst = arith.constant 0.000000e+00 : f32
    %0 = vector.broadcast %cst : f32 to vector<1x128xf32>
    %c0 = arith.constant 0 : index
    %c0_0 = arith.constant 0 : index
    %1 = vector.load %arg9[%c0, %c0_0] : memref<10x128xf32, #tpu.memory_space<vmem>>, vector<1x128xf32>
    tpu.vector_store %arg9[%c0, %c0_0], %0 {strides = array<i32>} : memref<10x128xf32, #tpu.memory_space<vmem>>, vector<1x128xf32>,
    %c9 = arith.constant 9 : index
    %c0_1 = arith.constant 0 : index
    %2 = vector.load %arg9[%c9, %c0_1] : memref<10x128xf32, #tpu.memory_space<vmem>>, vector<1x128xf32>
    tpu.vector_store %arg9[%c9, %c0_1], %0 {strides = array<i32>} : memref<10x128xf32, #tpu.memory_space<vmem>>, vector<1x128xf32>,
    %c0_2 = arith.constant 0 : index
    %c0_3 = arith.constant 0 : index
    %c0_4 = arith.constant 0 : index
    %3 = tpu.strided_load %arg1[%c0_2, %c0_3, %c0_4] {strides = array<i32: 1, 2, 1>} : memref<1x18x8xf32, #tpu.memory_space<vmem>>, vector<1x8x8xf32>
    %4 = vector.shape_cast %3 : vector<1x8x8xf32> to vector<8x8xf32>
    %c0_5 = arith.constant 0 : index
    %c1 = arith.constant 1 : index
    %c0_6 = arith.constant 0 : index
    %5 = tpu.strided_load %arg1[%c0_5, %c1, %c0_6] {strides = array<i32: 1, 2, 1>} : memref<1x18x8xf32, #tpu.memory_space<vmem>>, vector<1x8x8xf32>
    %6 = vector.shape_cast %5 : vector<1x8x8xf32> to vector<8x8xf32>
    %c0_7 = arith.constant 0 : index
    %c2 = arith.constant 2 : index
    %c0_8 = arith.constant 0 : index
    %7 = tpu.strided_load %arg1[%c0_7, %c2, %c0_8] {strides = array<i32: 1, 2, 1>} : memref<1x18x8xf32, #tpu.memory_space<vmem>>, vector<1x8x8xf32>
    %8 = vector.shape_cast %7 : vector<1x8x8xf32> to vector<8x8xf32>
    %c0_9 = arith.constant 0 : index
    %c3 = arith.constant 3 : index
    %c0_10 = arith.constant 0 : index
    %9 = tpu.strided_load %arg1[%c0_9, %c3, %c0_10] {strides = array<i32: 1, 2, 1>} : memref<1x18x8xf32, #tpu.memory_space<vmem>>, vector<1x8x8xf32>
    %10 = vector.shape_cast %9 : vector<1x8x8xf32> to vector<8x8xf32>
    %11 = tpu.concatenate %4, %6, %8, %10 in 1 : vector<8x8xf32>, vector<8x8xf32>, vector<8x8xf32>, vector<8x8xf32> -> vector<8x32xf32>
    %c0_11 = arith.constant 0 : index
    %c0_12 = arith.constant 0 : index
    %12 = vector.load %arg2[%c0_11, %c0_12] : memref<32x128xf32, #tpu.memory_space<vmem>>, vector<32x128xf32>
    %cst_13 = arith.constant dense<0.000000e+00> : vector<8x128xf32>
    %13 = tpu.matmul %11, %12, %cst_13 {dimension_numbers = #tpu.dot_dimension_numbers<[1], [0], [0], [1], [0, 0, 1, 1], [], []>} : vector<8x32xf32>, vector<32x128xf32>, vector<8x128xf32> -> vector<8x128xf32>
    %c0_14 = arith.constant 0 : index
    %c0_15 = arith.constant 0 : index
    %14 = vector.load %arg3[%c0_14, %c0_15] : memref<1x128xf32, #tpu.memory_space<vmem>>, vector<1x128xf32>
    %15 = vector.broadcast %14 : vector<1x128xf32> to vector<8x128xf32>
    %16 = arith.addf %13, %15 : vector<8x128xf32>
    %cst_16 = arith.constant 2.000000e-01 : f32
    %17 = vector.broadcast %cst_16 : f32 to vector<8x128xf32>
    %18 = arith.mulf %17, %16 : vector<8x128xf32>
    %19 = arith.maximumf %16, %18 : vector<8x128xf32>
    %c1_17 = arith.constant 1 : index
    %c0_18 = arith.constant 0 : index
    %20 = vector.load %arg9[%c1_17, %c0_18] : memref<10x128xf32, #tpu.memory_space<vmem>>, vector<8x128xf32>
    tpu.vector_store %arg9[%c1_17, %c0_18], %19 {strides = array<i32>} : memref<10x128xf32, #tpu.memory_space<vmem>>, vector<8x128xf32>,
    %c0_19 = arith.constant 0 : index
    %c0_20 = arith.constant 0 : index
    %21 = tpu.strided_load %arg9[%c0_19, %c0_20] {strides = array<i32: 2, 1>} : memref<10x128xf32, #tpu.memory_space<vmem>>, vector<4x128xf32>
    %c1_21 = arith.constant 1 : index
    %c0_22 = arith.constant 0 : index
    %22 = tpu.strided_load %arg9[%c1_21, %c0_22] {strides = array<i32: 2, 1>} : memref<10x128xf32, #tpu.memory_space<vmem>>, vector<4x128xf32>
    %c2_23 = arith.constant 2 : index
    %c0_24 = arith.constant 0 : index
    %23 = tpu.strided_load %arg9[%c2_23, %c0_24] {strides = array<i32: 2, 1>} : memref<10x128xf32, #tpu.memory_space<vmem>>, vector<4x128xf32>
    %c3_25 = arith.constant 3 : index
    %c0_26 = arith.constant 0 : index
    %24 = tpu.strided_load %arg9[%c3_25, %c0_26] {strides = array<i32: 2, 1>} : memref<10x128xf32, #tpu.memory_space<vmem>>, vector<4x128xf32>
    %25 = tpu.concatenate %21, %22, %23, %24 in 1 : vector<4x128xf32>, vector<4x128xf32>, vector<4x128xf32>, vector<4x128xf32> -> vector<4x512xf32>
    %c0_27 = arith.constant 0 : index
    %c0_28 = arith.constant 0 : index
    %26 = vector.load %arg4[%c0_27, %c0_28] : memref<512x128xf32, #tpu.memory_space<vmem>>, vector<512x128xf32>
    %cst_29 = arith.constant dense<0.000000e+00> : vector<4x128xf32>
    %27 = tpu.matmul %25, %26, %cst_29 {dimension_numbers = #tpu.dot_dimension_numbers<[1], [0], [0], [1], [0, 0, 1, 1], [], []>} : vector<4x512xf32>, vector<512x128xf32>, vector<4x128xf32> -> vector<4x128xf32>
    %c0_30 = arith.constant 0 : index
    %c0_31 = arith.constant 0 : index
    %28 = vector.load %arg5[%c0_30, %c0_31] : memref<1x128xf32, #tpu.memory_space<vmem>>, vector<1x128xf32>
    %29 = vector.broadcast %28 : vector<1x128xf32> to vector<4x128xf32>
    %30 = arith.addf %27, %29 : vector<4x128xf32>
    %cst_32 = arith.constant 2.000000e-01 : f32
    %31 = vector.broadcast %cst_32 : f32 to vector<4x128xf32>
    %32 = arith.mulf %31, %30 : vector<4x128xf32>
    %33 = arith.maximumf %30, %32 : vector<4x128xf32>
    %c0_33 = arith.constant 0 : index
    %c0_34 = arith.constant 0 : index
    %34 = vector.load %arg6[%c0_33, %c0_34] : memref<128x128xf32, #tpu.memory_space<vmem>>, vector<128x128xf32>
    %cst_35 = arith.constant dense<0.000000e+00> : vector<4x128xf32>
    %35 = tpu.matmul %33, %34, %cst_35 {dimension_numbers = #tpu.dot_dimension_numbers<[1], [0], [0], [1], [0, 0, 1, 1], [], []>} : vector<4x128xf32>, vector<128x128xf32>, vector<4x128xf32> -> vector<4x128xf32>
    %c0_36 = arith.constant 0 : index
    %c0_37 = arith.constant 0 : index
    %36 = vector.load %arg7[%c0_36, %c0_37] : memref<1x128xf32, #tpu.memory_space<vmem>>, vector<1x128xf32>
    %37 = vector.broadcast %36 : vector<1x128xf32> to vector<4x128xf32>
    %38 = arith.addf %35, %37 : vector<4x128xf32>
    %c0_38 = arith.constant 0 : index
    %c0_39 = arith.constant 0 : index
    %c0_40 = arith.constant 0 : index
    %39 = vector.load %arg8[%c0_38, %c0_39, %c0_40] : memref<1x4x128xf32, #tpu.memory_space<vmem>>, vector<1x4x128xf32>
    %40 = vector.shape_cast %39 : vector<1x4x128xf32> to vector<4x128xf32>
    %41 = vector.shape_cast %38 : vector<4x128xf32> to vector<1x4x128xf32>
    tpu.vector_store %arg8[%c0_38, %c0_39, %c0_40], %41 {strides = array<i32>} : memref<1x4x128xf32, #tpu.memory_space<vmem>>, vector<1x4x128xf32>,
    return
  }
  func.func @transform_0(%arg0: i32) -> (i32, i32, i32) {
    %c0_i32 = arith.constant 0 : i32
    %c0_i32_0 = arith.constant 0 : i32
    %c0_i32_1 = arith.constant 0 : i32
    return %arg0, %c0_i32, %c0_i32_0 : i32, i32, i32
  }
  func.func @transform_1(%arg0: i32) -> (i32, i32) {
    %c0_i32 = arith.constant 0 : i32
    %c0_i32_0 = arith.constant 0 : i32
    %c0_i32_1 = arith.constant 0 : i32
    return %c0_i32, %c0_i32_0 : i32, i32
  }
  func.func @transform_2(%arg0: i32) -> (i32, i32) {
    %c0_i32 = arith.constant 0 : i32
    %c0_i32_0 = arith.constant 0 : i32
    %c0_i32_1 = arith.constant 0 : i32
    return %c0_i32, %c0_i32_0 : i32, i32
  }
  func.func @transform_3(%arg0: i32) -> (i32, i32) {
    %c0_i32 = arith.constant 0 : i32
    %c0_i32_0 = arith.constant 0 : i32
    %c0_i32_1 = arith.constant 0 : i32
    return %c0_i32, %c0_i32_0 : i32, i32
  }
  func.func @transform_4(%arg0: i32) -> (i32, i32) {
    %c0_i32 = arith.constant 0 : i32
    %c0_i32_0 = arith.constant 0 : i32
    %c0_i32_1 = arith.constant 0 : i32
    return %c0_i32, %c0_i32_0 : i32, i32
  }
  func.func @transform_5(%arg0: i32) -> (i32, i32) {
    %c0_i32 = arith.constant 0 : i32
    %c0_i32_0 = arith.constant 0 : i32
    %c0_i32_1 = arith.constant 0 : i32
    return %c0_i32, %c0_i32_0 : i32, i32
  }
  func.func @transform_6(%arg0: i32) -> (i32, i32) {
    %c0_i32 = arith.constant 0 : i32
    %c0_i32_0 = arith.constant 0 : i32
    %c0_i32_1 = arith.constant 0 : i32
    return %c0_i32, %c0_i32_0 : i32, i32
  }
  func.func @transform_7(%arg0: i32) -> (i32, i32, i32) {
    %c0_i32 = arith.constant 0 : i32
    %c0_i32_0 = arith.constant 0 : i32
    %c0_i32_1 = arith.constant 0 : i32
    return %arg0, %c0_i32, %c0_i32_0 : i32, i32, i32
  }
}

</mosaic_0001>

<bundles_post_ra>
// kernel: movement_conv_encoder.1
= control target key start
LH: loop header
LB: loop body
LE: loop exit
PB: predicated region body
PF: predicated region fallthrough
CT: control target
= control target key end

     0   :  { %12 = vsyncpa [#allocation4], 0  ;;  %s1568_s0 = inlined_call_operand.vmem [shape: f32[2,18,8], index: 0, kind: input, shape index: {}]   ;;  %s1569_s1 = inlined_call_operand.vmem [shape: f32[32,128], index: 1, kind: input, shape index: {}]   ;;  %s1570_s2 = inlined_call_operand.vmem [shape: f32[1,128], index: 2, kind: input, shape index: {}]   ;;  %s1571_s3 = inlined_call_operand.vmem [shape: f32[512,128], index: 3, kind: input, shape index: {}]   ;;  %s1572_s4 = inlined_call_operand.vmem [shape: f32[1,128], index: 4, kind: input, shape index: {}]   ;;  %s1573_s5 = inlined_call_operand.vmem [shape: f32[128,128], index: 5, kind: input, shape index: {}]   ;;  %s1574_s6 = inlined_call_operand.vmem [shape: f32[1,128], index: 6, kind: input, shape index: {}]   ;;  %s1575_s7 = inlined_call_operand.hbm [shape: f32[2,4,128], index: 7, kind: output, shape index: {}]  }
   0x1   :  { %14 = vsyncpa [#allocation4 + $0x1], 0  ;;  %s1185_s24 = smov 0   ;;  %s1187_s25 = smov 0  }
   0x2   :  { %s1189_s26 = smov 0   ;;  %s1191_s27 = smov 0  }
   0x3 LB: > { %s1206_s28 = sadd.s32 4294967295, %s1136_s27   ;;  %s779_s29 = sadd.s32 4294967294, %s1136_s27   ;;  %s1136_s27 = sphi %s1191_s27, %s1581_s27   ;;  %s1132_s26 = sphi %s1189_s26, %s1580_s26   ;;  %s1128_s25 = sphi %s1187_s25, %s1579_s25   ;;  %s1124_s24 = sphi %s1185_s24, %s1578_s24  }
   0x4   : > { %s1210_s30 = sadd.s32 1, %s1136_s27   ;;  %s179_s8 = sadd.s32 1, %s1132_s26 }
   0x5   : > { %s176_s9 = ssub.s32 %s1136_s27, %s1210_s30  ;;  %p189_p0 = scmp.ne.s32.totalorder %s1132_s26, %s1128_s25 }
   0x6   : > { %p177_p1 = scmp.eq.s32.totalorder %s176_s9, 0  ;;  %p190_p2 = scmp.eq.s32.totalorder %s1206_s28, 1 }
   0x7   : > { %p195_p3 = scmp.ne.s32.totalorder %s1128_s25, %s1124_s24  ;;  %p196_p4 = scmp.eq.s32.totalorder %s779_s29, 1 }
   0x8   : > { %s1221_s10 = scalar_select %p177_p1, %s1132_s26, %s179_s8  }
   0x9   : > { %p1223_p5 = por %p190_p2, %p189_p0  ;;  %p1227_p6 = por %p196_p4, %p195_p3 }
   0xa   : > { %p782_p7 = scmp.ge.s32.totalorder %s1136_s27, 1  ;;  %p240_p8 = scmp.lt.s32.totalorder %s1136_s27, 3 }
   0xc   : > { %p241_p9 = pnand %p782_p7, %p240_p8 }
   0xd   : > { %p272_p10 = scmp.lt.s32.totalorder (!%p241_p9), %s1206_s28, 1  ;;  %v304_v0 = vld [vmem:[%s1569_s1] sm:$0xff] (!%p241_p9)  ;;  %v305_v1 = vld [vmem:[%s1569_s1 + $0x8] sm:$0xff] (!%p241_p9)  ;;  %v1138_v2 = vmov (!%p241_p9), 0.0|0.0   ;;  %v306_v4 = vld [vmem:[%s1569_s1 + $0x10] sm:$0xff] (!%p241_p9)  ;;  %v1139_v9 = vmov (!%p241_p9), 0.0  }
   0xe   : > { %244 = sbr.rel (%p241_p9) target bundleno = 826 (0x33a), region = 48  ;;  %934 = vmatprep.subr.bf16.mxu0 (!%p241_p9), %v1138_v2  ;;  %v935_v3 = vpack.c.bf16 (!%p241_p9), %v305_v1, %v304_v0  ;;  %v307_v5 = vld [vmem:[%s1569_s1 + $0x18] sm:$0xff] (!%p241_p9)  ;;  %v415_v6 = vld [vmem:[%s1571_s3 + $0x80] sm:$0xff] (!%p241_p9)  ;;  %v416_v7 = vld [vmem:[%s1571_s3 + $0x88] sm:$0xff] (!%p241_p9)  ;;  %277 = vst [vmem:[#allocation2] sm:$0x1] (!%p241_p9), %v1139_v9 }
   0xf   : > { %v938_v8 = vpack.c.bf16 (!%p241_p9), %v307_v5, %v306_v4  ;;  %278 = vst [vmem:[#allocation2 + $0x9] sm:$0x1] (!%p241_p9), %v1139_v9  ;;  %vm1140_vm0 = vmmov (!%p241_p9), 0   ;;  %v940_v10 = vpack.c.bf16 (!%p241_p9), %v416_v7, %v415_v6  ;;  %v447_v11 = vld [vmem:[%s1571_s3 + $0x180] sm:$0xff] (!%p241_p9)  ;;  %v448_v12 = vld [vmem:[%s1571_s3 + $0x188] sm:$0xff] (!%p241_p9)  ;;  %v417_v17 = vld [vmem:[%s1571_s3 + $0x90] sm:$0xff] (!%p241_p9) }
  0x10   : > { %936 = vmatpush3.bf16.msra.mxu0 (!%p241_p9), %v935_v3  ;;  %896 = vmatprep.mubr.msk.f32.mxu0 (!%p241_p9), %vm1140_vm0, %v1139_v9  ;;  %v399_v13 = vld [vmem:[%s1571_s3] sm:$0xff] (!%p241_p9)  ;;  %v400_v14 = vld [vmem:[%s1571_s3 + $0x8] sm:$0xff] (!%p241_p9)  ;;  %v972_v15 = vpack.c.bf16 (!%p241_p9), %v448_v12, %v447_v11  ;;  %v418_v18 = vld [vmem:[%s1571_s3 + $0x98] sm:$0xff] (!%p241_p9)  ;;  %s1141_s19 = smov (!%p241_p9), 8   ;;  %s1143_s15 = smov (!%p241_p9), 16   ;;  %vm298_vm1 = vcmask (!%p241_p9), 64512  }
  0x11   : > { %937 = vmatprep.subr.bf16.mxu0 (!%p241_p9), %v1138_v2  ;;  %941 = vmatprep.subr.bf16.mxu1 (!%p241_p9), %v940_v10  ;;  %v942_v16 = vpack.c.bf16 (!%p241_p9), %v400_v14, %v399_v13  ;;  %v944_v19 = vpack.c.bf16 (!%p241_p9), %v418_v18, %v417_v17  ;;  %v401_v20 = vld [vmem:[%s1571_s3 + $0x10] sm:$0xff] (!%p241_p9)  ;;  %v402_v21 = vld [vmem:[%s1571_s3 + $0x18] sm:$0xff] (!%p241_p9)  ;;  %v419_v26 = vld [vmem:[%s1571_s3 + $0xa0] sm:$0xff] (!%p241_p9)  ;;  %vm300_vm2 = vcmask (!%p241_p9), 130048   ;;  %vm302_vm3 = vcmask (!%p241_p9), 195584   ;;  %s269_s13 = sand.u32 (!%p241_p9), 1, %s1128_s25  }
  0x12   : > { %v946_v24 = vpack.c.bf16 (!%p241_p9), %v402_v21, %v401_v20  ;;  %v420_v27 = vld [vmem:[%s1571_s3 + $0xa8] sm:$0xff] (!%p241_p9)  ;;  %v403_v29 = vld [vmem:[%s1571_s3 + $0x20] sm:$0xff] (!%p241_p9)  ;;  %v421_v32 = vld [vmem:[%s1571_s3 + $0xb0] sm:$0xff] (!%p241_p9)  ;;  %vm315_vm4 = vcmask (!%p241_p9), 261120   ;;  %s783_s14 = sshll.u32 (!%p241_p9), %s269_s13, 2  ;;  %s793_s17 = sshll.u32 (!%p241_p9), %s1206_s28, 6 }
  0x13   : > { %943 = vmatpush3.bf16.msra.mxu1 (!%p241_p9), %v942_v16  ;;  %v948_v28 = vpack.c.bf16 (!%p241_p9), %v420_v27, %v419_v26  ;;  %v404_v30 = vld [vmem:[%s1571_s3 + $0x28] sm:$0xff] (!%p241_p9)  ;;  %v422_v33 = vld [vmem:[%s1571_s3 + $0xb8] sm:$0xff] (!%p241_p9)  ;;  %v405_v35 = vld [vmem:[%s1571_s3 + $0x30] sm:$0xff] (!%p241_p9)  ;;  %s1526_s22 = scalar_lea.hbm (!%p241_p9), %s1575_s7, %s793_s17  ;;  %s707_s23 = scalar_lea.sflag (!%p241_p9), [#allocation4], %s269_s13 }
  0x14   : > { %939 = vmatpush3.bf16.msra.mxu0 (!%p241_p9), %v938_v8  ;;  %945 = vmatprep.subr.bf16.mxu1 (!%p241_p9), %v944_v19  ;;  %v950_v31 = vpack.c.bf16 (!%p241_p9), %v404_v30, %v403_v29  ;;  %v952_v34 = vpack.c.bf16 (!%p241_p9), %v422_v33, %v421_v32  ;;  %v406_v36 = vld [vmem:[%s1571_s3 + $0x38] sm:$0xff] (!%p241_p9)  ;;  %v431_v40 = vld [vmem:[%s1571_s3 + $0x100] sm:$0xff] (!%p241_p9)  ;;  %v432_v41 = vld [vmem:[%s1571_s3 + $0x108] sm:$0xff] (!%p241_p9) }
  0x15   : > { %s273_s21 = scalar_select %p272_p10, %s1206_s28, 1  ;;  %973 = vmatprep.subr.bf16.mxu0 %v972_v15  ;;  %v954_v37 = vpack.c.bf16 %v406_v36, %v405_v35  ;;  %v449_v42 = vld [vmem:[%s1571_s3 + $0x190] sm:$0xff]  ;;  %v450_v43 = vld [vmem:[%s1571_s3 + $0x198] sm:$0xff]  ;;  %v974_v47 = vpack.c.bf16 %v432_v41, %v431_v40  ;;  %v451_v53 = vld [vmem:[%s1571_s3 + $0x1a0] sm:$0xff] }
  0x16   : > { %v976_v49 = vpack.c.bf16 %v450_v43, %v449_v42  ;;  %v433_v50 = vld [vmem:[%s1571_s3 + $0x110] sm:$0xff]  ;;  %v434_v51 = vld [vmem:[%s1571_s3 + $0x118] sm:$0xff]  ;;  %v452_v54 = vld [vmem:[%s1571_s3 + $0x1a8] sm:$0xff]  ;;  %s1144_s28 = smov [#allocation3]  }
  0x17   : > { %s1028_s18 = smul.u32 24, %s273_s21  ;;  %947 = vmatpush3.bf16.msra.mxu1 %v946_v24  ;;  %v978_v55 = vpack.c.bf16 %v434_v51, %v433_v50  ;;  %v980_v56 = vpack.c.bf16 %v452_v54, %v451_v53  ;;  %v435_v57 = vld [vmem:[%s1571_s3 + $0x120] sm:$0xff]  ;;  %v436_v58 = vld [vmem:[%s1571_s3 + $0x128] sm:$0xff]  ;;  %v453_v59 = vld [vmem:[%s1571_s3 + $0x1b0] sm:$0xff]  ;;  %s1078_s8 = sshll.u32 %s1144_s28, 4  ;;  %s1079_s8 = int_to_ptr.vmem [resolvable:$false] %s1078_s8 }
  0x18   : > { %949 = vmatprep.subr.bf16.mxu1 %v948_v28  ;;  %v454_v60 = vld [vmem:[%s1571_s3 + $0x1b8] sm:$0xff]  ;;  %v982_v61 = vpack.c.bf16 %v436_v58, %v435_v57  ;;  %v437_v63 = vld [vmem:[%s1571_s3 + $0x130] sm:$0xff]  ;;  %v423_v3 = vld [vmem:[%s1571_s3 + $0xc0] sm:$0xff]  ;;  %s1080_s9 = scalar_lea.vmem %s1079_s8, 128 }
  0x19   : > { %s1280_s21 = scalar_lea.vmem %s1568_s0, %s1028_s18  ;;  %s1142_s18 = smov 24   ;;  %v984_v62 = vpack.c.bf16 %v454_v60, %v453_v59  ;;  %v438_v0 = vld [vmem:[%s1571_s3 + $0x138] sm:$0xff]  ;;  %v424_v4 = vld [vmem:[%s1571_s3 + $0xc8] sm:$0xff]  ;;  %v455_v5 = vld [vmem:[%s1571_s3 + $0x1c0] sm:$0xff] }
  0x1a   : > { %v785_v22 = vld [vmem:[%s1280_s21 + $0x1] ss:$2 sm:$0xff]  ;;  %v786_v25 = vld [vmem:[%s1280_s21 + $0x2] ss:$2 sm:$0xff]  ;;  %v986_v1 = vpack.c.bf16 %v438_v0, %v437_v63  ;;  %v956_v6 = vpack.c.bf16 %v424_v4, %v423_v3  ;;  %v426_v17 = vld [vmem:[%s1571_s3 + $0xd8] sm:$0xff] }
  0x1b   : > { %v787_v23 = vld [vmem:[%s1280_s21 + $0x3] ss:$2 sm:$0xff]  ;;  %287 = vrot.lane.b32.xlu0 %v785_v22, %s1141_s19  ;;  %951 = vmatpush3.bf16.msra.mxu1 %v950_v31  ;;  %v279_v39 = vld [vmem:[%s1280_s21] ss:$2 sm:$0xff]  ;;  %v458_v20 = vld [vmem:[%s1571_s3 + $0x1d8] sm:$0xff]  ;;  %s271_s19 = scalar_lea.vmem [#allocation3], %s783_s14 }
  0x1c   : > { %295 = vrot.lane.b32.xlu1 %v787_v23, %s1142_s18  ;;  %953 = vmatprep.subr.bf16.mxu1 %v952_v34  ;;  %v456_v7 = vld [vmem:[%s1571_s3 + $0x1c8] sm:$0xff]  ;;  %v407_v8 = vld [vmem:[%s1571_s3 + $0x40] sm:$0xff]  ;;  %v425_v16 = vld [vmem:[%s1571_s3 + $0xd0] sm:$0xff]  ;;  %s720_s21 = sshll.u32 %s271_s19, 4  ;;  %s1528_s21 = int_to_ptr.vmem [resolvable:$true] %s720_s21 }
  0x1d   : > { %v408_v10 = vld [vmem:[%s1571_s3 + $0x48] sm:$0xff]  ;;  %v988_v11 = vpack.c.bf16 %v456_v7, %v455_v5  ;;  %v439_v13 = vld [vmem:[%s1571_s3 + $0x140] sm:$0xff]  ;;  %v457_v18 = vld [vmem:[%s1571_s3 + $0x1d0] sm:$0xff]  ;;  %v960_v19 = vpack.c.bf16 %v426_v17, %v425_v16  ;;  %s1074_s29 = scalar_lea.vmem %s1528_s21, 64  ;;  %p1081_p0 = scmp.lt.s32.totalorder %s1528_s21, %s1079_s8 }
  0x1e   : > { %v958_v12 = vpack.c.bf16 %v408_v10, %v407_v8  ;;  %v440_v14 = vld [vmem:[%s1571_s3 + $0x148] sm:$0xff]  ;;  %v409_v21 = vld [vmem:[%s1571_s3 + $0x50] sm:$0xff]  ;;  %v410_v22 = vld [vmem:[%s1571_s3 + $0x58] sm:$0xff]  ;;  %v992_v23 = vpack.c.bf16 %v458_v20, %v457_v18  ;;  %p1075_p11 = scmp.ne.s32.totalorder %s1528_s21, %s1074_s29  ;;  %p1082_p1 = scmp.lt.s32.totalorder %s1080_s9, %s1074_s29 }
  0x1f   : > { %291 = vrot.lane.b32.xlu0 %v786_v25, %s1143_s15  ;;  %955 = vmatpush3.bf16.msra.mxu1 %v954_v37  ;;  %v990_v15 = vpack.c.bf16 %v440_v14, %v439_v13  ;;  %v962_v24 = vpack.c.bf16 %v410_v22, %v409_v21  ;;  %v441_v25 = vld [vmem:[%s1571_s3 + $0x150] sm:$0xff]  ;;  %v442_v26 = vld [vmem:[%s1571_s3 + $0x158] sm:$0xff]  ;;  %v427_v28 = vld [vmem:[%s1571_s3 + $0xe0] sm:$0xff] }
  0x20   : > { %957 = vmatprep.subr.bf16.mxu1 %v956_v6  ;;  %v994_v27 = vpack.c.bf16 %v442_v26, %v441_v25  ;;  %v428_v29 = vld [vmem:[%s1571_s3 + $0xe8] sm:$0xff]  ;;  %v459_v30 = vld [vmem:[%s1571_s3 + $0x1e0] sm:$0xff]  ;;  %v430_v41 = vld [vmem:[%s1571_s3 + $0xf8] sm:$0xff]  ;;  %p1076_p12 = pnand %p1075_p11, %p1223_p5  ;;  %p1083_p2 = por %p1082_p1, %p1081_p0 }
  0x21   : > { %v964_v31 = vpack.c.bf16 %v428_v29, %v427_v28  ;;  %v460_v32 = vld [vmem:[%s1571_s3 + $0x1e8] sm:$0xff]  ;;  %v411_v33 = vld [vmem:[%s1571_s3 + $0x60] sm:$0xff]  ;;  %v461_v42 = vld [vmem:[%s1571_s3 + $0x1f0] sm:$0xff] }
  0x22   : > { %v412_v34 = vld [vmem:[%s1571_s3 + $0x68] sm:$0xff]  ;;  %v996_v35 = vpack.c.bf16 %v460_v32, %v459_v30  ;;  %v443_v37 = vld [vmem:[%s1571_s3 + $0x160] sm:$0xff]  ;;  %v462_v43 = vld [vmem:[%s1571_s3 + $0x1f8] sm:$0xff]  ;;  %p1077_p13 = pneg %p1076_p12 }
  0x23   : > { %959 = vmatpush3.bf16.msra.mxu1 %v958_v12  ;;  %v966_v36 = vpack.c.bf16 %v412_v34, %v411_v33  ;;  %v446_v50 = vld [vmem:[%s1571_s3 + $0x178] sm:$0xff]  ;;  %v612_v58 = vld [vmem:[%s1573_s5] sm:$0xff]  ;;  %v613_v59 = vld [vmem:[%s1573_s5 + $0x8] sm:$0xff] }
  0x24   : > { %961 = vmatprep.subr.bf16.mxu1 %v960_v19  ;;  %v1005_v60 = vpack.c.bf16 %v613_v59, %v612_v58  ;;  %v616_v5 = vld [vmem:[%s1573_s5 + $0x20] sm:$0xff]  ;;  %v617_v6 = vld [vmem:[%s1573_s5 + $0x28] sm:$0xff]  ;;  %v618_v8 = vld [vmem:[%s1573_s5 + $0x30] sm:$0xff]  ;;  %p1084_p3 = pnand %p1083_p2, %p1077_p13 }
  0x25   : > { %v1011_v7 = vpack.c.bf16 %v617_v6, %v616_v5  ;;  %v621_v12 = vld [vmem:[%s1573_s5 + $0x48] sm:$0xff]  ;;  %v622_v14 = vld [vmem:[%s1573_s5 + $0x50] sm:$0xff]  ;;  %v624_v17 = vld [vmem:[%s1573_s5 + $0x60] sm:$0xff] }
  0x26   : > { %v625_v18 = vld [vmem:[%s1573_s5 + $0x68] sm:$0xff]  ;;  %v626_v20 = vld [vmem:[%s1573_s5 + $0x70] sm:$0xff]  ;;  %v627_v21 = vld [vmem:[%s1573_s5 + $0x78] sm:$0xff] }
  0x27   : > { %963 = vmatpush3.bf16.msra.mxu1 %v962_v24  ;;  %v1023_v19 = vpack.c.bf16 %v625_v18, %v624_v17  ;;  %v1026_v22 = vpack.c.bf16 %v627_v21, %v626_v20  ;;  %v790_v25 = vld [vmem:[%s1572_s4] ss:$0 sm:$0xff] }
  0x28   : > { %965 = vmatprep.subr.bf16.mxu1 %v964_v31  ;;  %v791_v33 = vld [vmem:[%s1574_s6] ss:$0 sm:$0xff] }
  0x2b   : > { %967 = vmatpush3.bf16.msra.mxu1 %v966_v36 }
  0x8d   : > { %v288_v38 = vpop.permute.xlu0 %287 }
  0x8e   : > { %v296_v44 = vpop.permute.xlu1 %295  ;;  %v299_v45 = vsel %vm298_vm1, %v279_v39, %v288_v38  ;;  %v444_v38 = vld [vmem:[%s1571_s3 + $0x168] sm:$0xff]  ;;  %v429_v39 = vld [vmem:[%s1571_s3 + $0xf0] sm:$0xff] }
  0x8f   : > { %v998_v40 = vpack.c.bf16 %v444_v38, %v443_v37 }
  0x91   : > { %v292_v46 = vpop.permute.xlu0 %291 }
  0x92   : > { %v301_v48 = vsel %vm300_vm2, %v299_v45, %v292_v46  ;;  %v1000_v45 = vpack.c.bf16 %v462_v43, %v461_v42  ;;  %v413_v46 = vld [vmem:[%s1571_s3 + $0x70] sm:$0xff] }
  0x93   : > { %v303_v52 = vsel %vm302_vm3, %v301_v48, %v296_v44  ;;  %v968_v44 = vpack.c.bf16 %v430_v41, %v429_v39  ;;  %v445_v48 = vld [vmem:[%s1571_s3 + $0x170] sm:$0xff] }
  0x94   : > { %897 = vmatmul.mubr.msk.f32.vlgmr.msra.gmra.mrb[0].mxu0 %vm315_vm4, %v303_v52  ;;  %v1002_v51 = vpack.c.bf16 %v446_v50, %v445_v48  ;;  %v788_v52 = vld [vmem:[%s1570_s2] ss:$0 sm:$0xff] }
  0x95   : > { %975 = vmatpush3.bf16.msra.mxu0 %v974_v47  ;;  %v414_v47 = vld [vmem:[%s1571_s3 + $0x78] sm:$0xff]  ;;  %969 = vmatprep.subr.bf16.mxu1 %v968_v44 }
  0x96   : > { %977 = vmatprep.subr.bf16.mxu0 %v976_v49  ;;  %v970_v49 = vpack.c.bf16 %v414_v47, %v413_v46 }
  0x98   : > { %971 = vmatpush3.bf16.msra.mxu1 %v970_v49 }
  0x99   : > { %979 = vmatpush3.bf16.msra.mxu0 %v978_v55  ;;  %1004 = vmatprep.subr.bf16.mxu1 %v1138_v2 }
  0x9a   : > { %981 = vmatprep.subr.bf16.mxu0 %v980_v56 }
  0x9d   : > { %983 = vmatpush3.bf16.msra.mxu0 %v982_v61  ;;  %v614_v61 = vld [vmem:[%s1573_s5 + $0x10] sm:$0xff] }
  0x9e   : > { %985 = vmatprep.subr.bf16.mxu0 %v984_v62  ;;  %v615_v62 = vld [vmem:[%s1573_s5 + $0x18] sm:$0xff] }
  0x9f   : > { %v1008_v4 = vpack.c.bf16 %v615_v62, %v614_v61 }
  0xa1   : > { %987 = vmatpush3.bf16.msra.mxu0 %v986_v1 }
  0xa2   : > { %989 = vmatprep.subr.bf16.mxu0 %v988_v11  ;;  %v620_v11 = vld [vmem:[%s1573_s5 + $0x40] sm:$0xff] }
  0xa3   : > { %v1017_v13 = vpack.c.bf16 %v621_v12, %v620_v11 }
  0xa5   : > { %991 = vmatpush3.bf16.msra.mxu0 %v990_v15  ;;  %v623_v15 = vld [vmem:[%s1573_s5 + $0x58] sm:$0xff] }
  0xa6   : > { %993 = vmatprep.subr.bf16.mxu0 %v992_v23  ;;  %v1020_v16 = vpack.c.bf16 %v623_v15, %v622_v14 }
  0xa9   : > { %995 = vmatpush3.bf16.msra.mxu0 %v994_v27 }
  0xaa   : > { %997 = vmatprep.subr.bf16.mxu0 %v996_v35 }
  0xad   : > { %999 = vmatpush3.bf16.msra.mxu0 %v998_v40 }
  0xae   : > { %1001 = vmatprep.subr.bf16.mxu0 %v1000_v45 }
  0xb1   : > { %1003 = vmatpush3.bf16.msra.mxu0 %v1002_v51 }
 0x167   : > { %v385_v53 = vpop.f32.mrb[0].mxu0 }
 0x168   : > { %v386_v54 = vadd.f32 %v788_v52, %v385_v53  ;;  %v898_v55 = vpop.f32.mrb[1].mxu0 }
 0x16a   : > { %v389_v56 = vmul.f32 0.2, %v386_v54 }
 0x16c   : > { %v390_v57 = vmax.f32 %v386_v54, %v389_v56 }
 0x16e   : > { %391 = vst [vmem:[#allocation2 + $0x1] sm:$0xff] %v390_v57 }
 0x175   : > { %v394_v63 = vld [vmem:[#allocation2 + $0x1] ss:$2 sm:$0xf]  ;;  %v392_v1 = vld [vmem:[#allocation2] ss:$2 sm:$0xf] }
 0x176   : > { %v398_v0 = vld [vmem:[#allocation2 + $0x3] ss:$2 sm:$0xf]  ;;  %534 = vmatprep.mubr.f32.mxu1 %v394_v63  ;;  %v396_v3 = vld [vmem:[#allocation2 + $0x2] ss:$2 sm:$0xf] }
 0x177   : > { %604 = vmatprep.mubr.f32.mxu0 %v398_v0  ;;  %535 = vmatmul.mubr.f32.vlgmr.msra.gmra.mrb[0].mxu1 %v392_v1 }
 0x178   : > { %605 = vmatmul.mubr.f32.vlgmr.msra.gmra.mrb[2].mxu0 %v396_v3  ;;  %1006 = vmatpush3.bf16.msra.mxu1 %v1005_v60 }
 0x179   : > { %931 = vmatprep.mubr.msk.f32.mxu1 %vm1140_vm0, %v1139_v9  ;;  %1007 = vmatprep.subr.bf16.mxu1 %v1138_v2  ;;  %v619_v9 = vld [vmem:[%s1573_s5 + $0x38] sm:$0xff] }
 0x17a   : > { %v1014_v10 = vpack.c.bf16 %v619_v9, %v618_v8 }
 0x17c   : > { %1009 = vmatpush3.bf16.msra.mxu1 %v1008_v4 }
 0x17d   : > { %1010 = vmatprep.subr.bf16.mxu1 %v1138_v2 }
 0x180   : > { %1012 = vmatpush3.bf16.msra.mxu1 %v1011_v7 }
 0x181   : > { %1013 = vmatprep.subr.bf16.mxu1 %v1138_v2 }
 0x184   : > { %1015 = vmatpush3.bf16.msra.mxu1 %v1014_v10 }
 0x185   : > { %1016 = vmatprep.subr.bf16.mxu1 %v1138_v2 }
 0x188   : > { %1018 = vmatpush3.bf16.msra.mxu1 %v1017_v13 }
 0x189   : > { %1019 = vmatprep.subr.bf16.mxu1 %v1138_v2 }
 0x18c   : > { %1021 = vmatpush3.bf16.msra.mxu1 %v1020_v16 }
 0x18d   : > { %1022 = vmatprep.subr.bf16.mxu1 %v1138_v2 }
 0x190   : > { %1024 = vmatpush3.bf16.msra.mxu1 %v1023_v19 }
 0x191   : > { %1025 = vmatprep.subr.bf16.mxu1 %v1138_v2 }
 0x194   : > { %1027 = vmatpush3.bf16.msra.mxu1 %v1026_v22 }
 0x24a   : > { %v833_v23 = vpop.f32.mrb[0].mxu1 }
 0x24b   : > { %v868_v24 = vpop.f32.mrb[2].mxu0  ;;  %v834_v26 = vpop.f32.mrb[1].mxu1 }
 0x24c   : > { %v869_v2 = vpop.f32.mrb[3].mxu0  ;;  %v835_v27 = vadd.f32 %v834_v26, %v833_v23 }
 0x24d   : > { %v870_v28 = vadd.f32 %v869_v2, %v868_v24 }
 0x24e   : > { %v537_v29 = vadd.f32 %v835_v27, %v790_v25 }
 0x250   : > { %v607_v30 = vadd.f32 %v870_v28, %v537_v29 }
 0x252   : > { %v610_v31 = vmul.f32 0.2, %v607_v30 }
 0x254   : > { %v611_v32 = vmax.f32 %v607_v30, %v610_v31 }
 0x256   : > { %932 = vmatmul.mubr.f32.vlgmr.msra.gmra.mrb[2].mxu1 %v611_v32 }
 0x329   : > { %v701_v34 = vpop.f32.mrb[2].mxu1 }
 0x32a   : > { %v702_v35 = vadd.f32 %v791_v33, %v701_v34  ;;  %v933_v36 = vpop.f32.mrb[3].mxu1 }
 0x32c   : > { %705 = vst [vmem:[%s271_s19] sm:$0xf] %v702_v35 }
 0x32d   : > { %1087 = shalt.err (!%p1084_p3)
}
 0x32e   : > { %s1088_s13 = scalar_lea.hbm %s1526_s22, 64  ;;  %s1092_s16 = scalar_lea.hbm %s1575_s7, 128 }
 0x32f   : > { %p1089_p4 = scmp.ne.s32.totalorder %s1526_s22, %s1088_s13  ;;  %p1093_p9 = scmp.lt.u32.totalorder %s1526_s22, %s1575_s7 }
 0x330   : > { %p1094_p10 = scmp.lt.u32.totalorder %s1092_s16, %s1088_s13  ;;  %p1096_p12 = scmp.lt.u32.totalorder %s1088_s13, %s1526_s22 }
 0x331   : > { %p1090_p7 = pnand %p1089_p4, %p1223_p5 }
 0x332   : > { %p1095_p11 = por %p1094_p10, %p1093_p9 }
 0x333   : > { %p1091_p8 = pneg %p1090_p7 }
 0x334   : > { %p1097_p13 = por %p1096_p12, %p1095_p11 }
 0x336   : > { %p1098_p0 = pnand %p1097_p13, %p1091_p8 }
 0x338   : > { %1101 = shalt.err (!%p1098_p0)
}
 0x339   : > { %1029 = dma.vmem_to_hbm [thread:$0]  (%p1223_p5), %s1528_s21, 64, %s1526_s22, %s707_s23  }
 0x33a PF: > { %p1035_p1 = scmp.ge.s32.totalorder %s1136_s27, 2  ;;  %s732_s18 = sand.u32 1, %s1124_s24  }
 0x33b   : > { %s733_s20 = scalar_lea.sflag [#allocation4], %s732_s18 }
 0x33c   : > { %p1032_p2 = pnand %p1035_p1, %p1227_p6 }
 0x33e   : > { %1119 = dma.done.wait (!%p1032_p2), %s733_s20, 64  }
 0x33f   : > { %1121 = vsyncadd (!%p1032_p2), %s733_s20, 4294967232  ;;  %p17_p3 = scmp.ge.s32.totalorder %s1210_s30, 4   ;;  %s1578_s24 = smov %s1128_s25 }
 0x340   : > { %s1579_s25 = smov %s1132_s26  ;;  %s1580_s26 = smov %s1221_s10 }
 0x341   : > { %s1581_s27 = smov %s1210_s30  ;;  %19 = sbr.rel (!%p17_p3) target bundleno = 3 (0x3), region = 89 }
 0x348   :  { %738 = vsyncpa [#allocation4], 1 }
 0x349   :  { %740 = vsyncpa [#allocation4 + $0x1], 1 }

</bundles_post_ra>
